<compile_context>
chip_gen: v7x
topology: tpu7x:2x2x1
jax: 0.10.0
libtpu: 0.0.40
codegen_flags: <defaults>
</compile_context>

<pallas_src>
import numpy as np
import jax
import jax.numpy as jnp
from jax.experimental import pallas as pl
from jax.experimental.pallas import tpu as pltpu

FEAT_DIM = 512
POOL_OUT = 7  # synthetic-head pool size


# ----------------------------------------------------------------------------
# Composite pooling matrices (exact PyTorch adaptive-avg-pool bin formula).
# ----------------------------------------------------------------------------
def _pool_matrix(in_size, out_size):
    m = np.zeros((out_size, in_size), np.float32)
    for i in range(out_size):
        s = (i * in_size) // out_size
        e = -((-(i + 1) * in_size) // out_size)      # ceil((i+1)*in/out)
        m[i, s:e] = 1.0 / float(e - s)
    return m


def _composite_axis(in_size, crop_lo, crop_hi, apply_256_pool):
    """[optional pool->256] -> crop -> pool->112 -> pool->7, as one (7, in) matrix."""
    mats = []
    cur = in_size
    if apply_256_pool:
        mats.append(_pool_matrix(cur, 256))
        cur = 256
    crop = np.zeros((crop_hi - crop_lo, cur), np.float32)
    crop[np.arange(crop_hi - crop_lo), np.arange(crop_lo, crop_hi)] = 1.0
    mats.append(crop)
    cur = crop_hi - crop_lo
    mats.append(_pool_matrix(cur, 112))
    mats.append(_pool_matrix(112, POOL_OUT))
    out = mats[0]
    for m in mats[1:]:
        out = m @ out
    return out                                        # (7, in_size)


# ----------------------------------------------------------------------------
# Fused kernel: composite pool + projection + L2 norm, one sample per grid step.
#   x_ref  : (1, C*H, W)   flattened NCHW sample
#   chb_ref: (C*7, C*H)    block-diagonal H-axis composite (one block per channel)
#   cw_ref : (7, W)        W-axis composite
#   w_ref  : (7, C*7, D)   projection weight re-ordered as [q, (c,p), d]
#   o_ref  : (1, 1, D)     l2-normalized feature (lane-dense, D = 512)
# ----------------------------------------------------------------------------
def _id_feat_kernel(x_ref, chb_ref, cw_ref, w_ref, o_ref):
    x2d = x_ref[0]                                                  # (C*H, W)
    # H-axis contraction for all channels at once: (C*7, W)
    t = jnp.dot(chb_ref[...], x2d, preferred_element_type=jnp.float32)
    # W-axis contraction, transposed result: rows q, cols (c,p) -> (7, C*7)
    p_t = jax.lax.dot_general(
        cw_ref[...], t, (((1,), (1,)), ((), ())),
        preferred_element_type=jnp.float32)
    # Projection: z[d] = sum_{q,(c,p)} p_t[q,(c,p)] * W[(c,p,q), d]
    nq = w_ref.shape[0]
    z = jnp.dot(p_t[0:1, :], w_ref[0], preferred_element_type=jnp.float32)
    for q in range(1, nq):                                          # static unroll
        z = z + jnp.dot(p_t[q:q + 1, :], w_ref[q],
                        preferred_element_type=jnp.float32)
    # L2 normalize via rsqrt (EUP path); tiny eps guards an all-zero vector.
    inv = jax.lax.rsqrt(jnp.sum(z * z, axis=-1, keepdims=True) + 1e-12)
    o_ref[0] = z * inv


def extract_feats_batched(x, ch_blk, cw, w_eff):
    NB, C, H, W = x.shape
    D = w_eff.shape[-1]
    x2 = x.reshape(NB, C * H, W)                      # contiguous, free reshape
    out = pl.pallas_call(
        _id_feat_kernel,
        out_shape=jax.ShapeDtypeStruct((NB, 1, D), jnp.float32),
        grid=(NB,),
        in_specs=[
            pl.BlockSpec((1, C * H, W), lambda n: (n, 0, 0)),
            pl.BlockSpec(ch_blk.shape, lambda n: (0, 0)),
            pl.BlockSpec(cw.shape, lambda n: (0, 0)),
            pl.BlockSpec(w_eff.shape, lambda n: (0, 0, 0)),
        ],
        out_specs=pl.BlockSpec((1, 1, D), lambda n: (n, 0, 0)),
        compiler_params=pltpu.CompilerParams(
            dimension_semantics=("parallel",)),
    )(x2, ch_blk, cw, w_eff)
    return out.reshape(NB, D)


# ----------------------------------------------------------------------------
# IDLoss forward
# ----------------------------------------------------------------------------
def id_loss_forward(y_hat, y, w_feat):
    B, C, H, W = y.shape
    D = w_feat.shape[1]
    apply_256 = (H != 256)                            # mirrors reference check
    ch = _composite_axis(H, 35, 223, apply_256)       # (7, H)
    cw = _composite_axis(W, 32, 220, apply_256)       # (7, W)
    ch_blk = jnp.asarray(np.kron(np.eye(C, dtype=np.float32), ch))  # (C*7, C*H)
    cw = jnp.asarray(cw)
    # Re-order projection weight rows from (c, p, q) flat order to [q, (c, p)].
    w_eff = jnp.transpose(
        w_feat.reshape(C, POOL_OUT, POOL_OUT, D), (2, 0, 1, 3)
    ).reshape(POOL_OUT, C * POOL_OUT, D)

    # One fused pass over both images (y_hat first, y second).
    x_all = jnp.concatenate([y_hat, y], axis=0)                     # (2B,C,H,W)
    feats = extract_feats_batched(x_all, ch_blk, cw, w_eff)         # (2B, D)
    y_hat_feats = feats[:B]
    y_feats = jax.lax.stop_gradient(feats[B:])        # .detach()

    # Per-sample (1 - <y_hat, y>) averaged over the batch: tiny -> plain jnp.
    loss = jnp.mean(1.0 - jnp.sum(y_hat_feats * y_feats, axis=-1))
    sim_improvement = jnp.zeros((), jnp.float32)      # 0 / count in reference
    return loss, sim_improvement


if __name__ == "__main__":
    key = jax.random.PRNGKey(0)
    k1, k2, k3 = jax.random.split(key, 3)

    B, C, H, W = 2, 3, 256, 256
    y_hat = jax.random.normal(k1, (B, C, H, W), jnp.float32)
    y = jax.random.normal(k2, (B, C, H, W), jnp.float32)

    # deterministic synthetic feature-head weight (3*7*7 -> 512)
    w_feat = jax.random.normal(
        k3, (C * POOL_OUT * POOL_OUT, FEAT_DIM), jnp.float32) * 0.02

    fwd = jax.jit(id_loss_forward)
    loss, sim = fwd(y_hat, y, w_feat)
    loss = jax.block_until_ready(loss)
    sim = jax.block_until_ready(sim)

    assert np.isfinite(np.asarray(loss)), "loss is not finite"
    print("KERNEL_OK")
</pallas_src>

<mosaic_0001>
module attributes {stable_mosaic.version = 11 : i64} {
  func.func @_id_feat_kernel(%arg0: i32, %arg1: memref<1x768x256xf32, #tpu.memory_space<vmem>>, %arg2: memref<21x768xf32, #tpu.memory_space<vmem>>, %arg3: memref<7x256xf32, #tpu.memory_space<vmem>>, %arg4: memref<7x21x512xf32, #tpu.memory_space<vmem>>, %arg5: memref<1x1x512xf32, #tpu.memory_space<vmem>>) attributes {dimension_semantics = [#tpu.dimension_semantics<parallel>], iteration_bounds = array<i64: 4>, scalar_prefetch = 0 : i64, scratch_operands = 0 : i64, tpu.core_type = #tpu.core_type<tc>, window_params = [{transform_indices = @transform_0, window_bounds = array<i64: 1, 768, 256>}, {pipeline_mode = #tpu.pipeline_mode<synchronous>, transform_indices = @transform_1, window_bounds = array<i64: 21, 768>}, {pipeline_mode = #tpu.pipeline_mode<synchronous>, transform_indices = @transform_2, window_bounds = array<i64: 7, 256>}, {pipeline_mode = #tpu.pipeline_mode<synchronous>, transform_indices = @transform_3, window_bounds = array<i64: 7, 21, 512>}, {transform_indices = @transform_4, window_bounds = array<i64: 1, 1, 512>}]} {
    %c0 = arith.constant 0 : index
    %c0_0 = arith.constant 0 : index
    %c0_1 = arith.constant 0 : index
    %0 = vector.load %arg1[%c0, %c0_0, %c0_1] : memref<1x768x256xf32, #tpu.memory_space<vmem>>, vector<1x768x256xf32>
    %1 = vector.shape_cast %0 : vector<1x768x256xf32> to vector<768x256xf32>
    %c0_2 = arith.constant 0 : index
    %c0_3 = arith.constant 0 : index
    %2 = vector.load %arg2[%c0_2, %c0_3] : memref<21x768xf32, #tpu.memory_space<vmem>>, vector<21x768xf32>
    %cst = arith.constant dense<0.000000e+00> : vector<21x256xf32>
    %3 = tpu.matmul %2, %1, %cst {dimension_numbers = #tpu.dot_dimension_numbers<[1], [0], [0], [1], [0, 0, 1, 1], [], []>} : vector<21x768xf32>, vector<768x256xf32>, vector<21x256xf32> -> vector<21x256xf32>
    %c0_4 = arith.constant 0 : index
    %c0_5 = arith.constant 0 : index
    %4 = vector.load %arg3[%c0_4, %c0_5] : memref<7x256xf32, #tpu.memory_space<vmem>>, vector<7x256xf32>
    %cst_6 = arith.constant dense<0.000000e+00> : vector<7x21xf32>
    %5 = tpu.matmul %4, %3, %cst_6 {dimension_numbers = #tpu.dot_dimension_numbers<[1], [1], [0], [0], [0, 0, 1, 0], [], []>} : vector<7x256xf32>, vector<21x256xf32>, vector<7x21xf32> -> vector<7x21xf32>
    %6 = vector.extract_strided_slice %5 {offsets = [0, 0], sizes = [1, 21], strides = [1, 1]} : vector<7x21xf32> to vector<1x21xf32>
    %c0_7 = arith.constant 0 : index
    %c0_8 = arith.constant 0 : index
    %c0_9 = arith.constant 0 : index
    %7 = vector.load %arg4[%c0_7, %c0_8, %c0_9] : memref<7x21x512xf32, #tpu.memory_space<vmem>>, vector<1x21x512xf32>
    %8 = vector.shape_cast %7 : vector<1x21x512xf32> to vector<21x512xf32>
    %cst_10 = arith.constant dense<0.000000e+00> : vector<1x512xf32>
    %9 = tpu.matmul %6, %8, %cst_10 {dimension_numbers = #tpu.dot_dimension_numbers<[1], [0], [0], [1], [0, 0, 1, 1], [], []>} : vector<1x21xf32>, vector<21x512xf32>, vector<1x512xf32> -> vector<1x512xf32>
    %10 = vector.extract_strided_slice %5 {offsets = [1, 0], sizes = [1, 21], strides = [1, 1]} : vector<7x21xf32> to vector<1x21xf32>
    %c1 = arith.constant 1 : index
    %c0_11 = arith.constant 0 : index
    %c0_12 = arith.constant 0 : index
    %11 = vector.load %arg4[%c1, %c0_11, %c0_12] : memref<7x21x512xf32, #tpu.memory_space<vmem>>, vector<1x21x512xf32>
    %12 = vector.shape_cast %11 : vector<1x21x512xf32> to vector<21x512xf32>
    %cst_13 = arith.constant dense<0.000000e+00> : vector<1x512xf32>
    %13 = tpu.matmul %10, %12, %cst_13 {dimension_numbers = #tpu.dot_dimension_numbers<[1], [0], [0], [1], [0, 0, 1, 1], [], []>} : vector<1x21xf32>, vector<21x512xf32>, vector<1x512xf32> -> vector<1x512xf32>
    %14 = arith.addf %9, %13 : vector<1x512xf32>
    %15 = vector.extract_strided_slice %5 {offsets = [2, 0], sizes = [1, 21], strides = [1, 1]} : vector<7x21xf32> to vector<1x21xf32>
    %c2 = arith.constant 2 : index
    %c0_14 = arith.constant 0 : index
    %c0_15 = arith.constant 0 : index
    %16 = vector.load %arg4[%c2, %c0_14, %c0_15] : memref<7x21x512xf32, #tpu.memory_space<vmem>>, vector<1x21x512xf32>
    %17 = vector.shape_cast %16 : vector<1x21x512xf32> to vector<21x512xf32>
    %cst_16 = arith.constant dense<0.000000e+00> : vector<1x512xf32>
    %18 = tpu.matmul %15, %17, %cst_16 {dimension_numbers = #tpu.dot_dimension_numbers<[1], [0], [0], [1], [0, 0, 1, 1], [], []>} : vector<1x21xf32>, vector<21x512xf32>, vector<1x512xf32> -> vector<1x512xf32>
    %19 = arith.addf %14, %18 : vector<1x512xf32>
    %20 = vector.extract_strided_slice %5 {offsets = [3, 0], sizes = [1, 21], strides = [1, 1]} : vector<7x21xf32> to vector<1x21xf32>
    %c3 = arith.constant 3 : index
    %c0_17 = arith.constant 0 : index
    %c0_18 = arith.constant 0 : index
    %21 = vector.load %arg4[%c3, %c0_17, %c0_18] : memref<7x21x512xf32, #tpu.memory_space<vmem>>, vector<1x21x512xf32>
    %22 = vector.shape_cast %21 : vector<1x21x512xf32> to vector<21x512xf32>
    %cst_19 = arith.constant dense<0.000000e+00> : vector<1x512xf32>
    %23 = tpu.matmul %20, %22, %cst_19 {dimension_numbers = #tpu.dot_dimension_numbers<[1], [0], [0], [1], [0, 0, 1, 1], [], []>} : vector<1x21xf32>, vector<21x512xf32>, vector<1x512xf32> -> vector<1x512xf32>
    %24 = arith.addf %19, %23 : vector<1x512xf32>
    %25 = vector.extract_strided_slice %5 {offsets = [4, 0], sizes = [1, 21], strides = [1, 1]} : vector<7x21xf32> to vector<1x21xf32>
    %c4 = arith.constant 4 : index
    %c0_20 = arith.constant 0 : index
    %c0_21 = arith.constant 0 : index
    %26 = vector.load %arg4[%c4, %c0_20, %c0_21] : memref<7x21x512xf32, #tpu.memory_space<vmem>>, vector<1x21x512xf32>
    %27 = vector.shape_cast %26 : vector<1x21x512xf32> to vector<21x512xf32>
    %cst_22 = arith.constant dense<0.000000e+00> : vector<1x512xf32>
    %28 = tpu.matmul %25, %27, %cst_22 {dimension_numbers = #tpu.dot_dimension_numbers<[1], [0], [0], [1], [0, 0, 1, 1], [], []>} : vector<1x21xf32>, vector<21x512xf32>, vector<1x512xf32> -> vector<1x512xf32>
    %29 = arith.addf %24, %28 : vector<1x512xf32>
    %30 = vector.extract_strided_slice %5 {offsets = [5, 0], sizes = [1, 21], strides = [1, 1]} : vector<7x21xf32> to vector<1x21xf32>
    %c5 = arith.constant 5 : index
    %c0_23 = arith.constant 0 : index
    %c0_24 = arith.constant 0 : index
    %31 = vector.load %arg4[%c5, %c0_23, %c0_24] : memref<7x21x512xf32, #tpu.memory_space<vmem>>, vector<1x21x512xf32>
    %32 = vector.shape_cast %31 : vector<1x21x512xf32> to vector<21x512xf32>
    %cst_25 = arith.constant dense<0.000000e+00> : vector<1x512xf32>
    %33 = tpu.matmul %30, %32, %cst_25 {dimension_numbers = #tpu.dot_dimension_numbers<[1], [0], [0], [1], [0, 0, 1, 1], [], []>} : vector<1x21xf32>, vector<21x512xf32>, vector<1x512xf32> -> vector<1x512xf32>
    %34 = arith.addf %29, %33 : vector<1x512xf32>
    %35 = vector.extract_strided_slice %5 {offsets = [6, 0], sizes = [1, 21], strides = [1, 1]} : vector<7x21xf32> to vector<1x21xf32>
    %c6 = arith.constant 6 : index
    %c0_26 = arith.constant 0 : index
    %c0_27 = arith.constant 0 : index
    %36 = vector.load %arg4[%c6, %c0_26, %c0_27] : memref<7x21x512xf32, #tpu.memory_space<vmem>>, vector<1x21x512xf32>
    %37 = vector.shape_cast %36 : vector<1x21x512xf32> to vector<21x512xf32>
    %cst_28 = arith.constant dense<0.000000e+00> : vector<1x512xf32>
    %38 = tpu.matmul %35, %37, %cst_28 {dimension_numbers = #tpu.dot_dimension_numbers<[1], [0], [0], [1], [0, 0, 1, 1], [], []>} : vector<1x21xf32>, vector<21x512xf32>, vector<1x512xf32> -> vector<1x512xf32>
    %39 = arith.addf %34, %38 : vector<1x512xf32>
    %40 = arith.mulf %39, %39 : vector<1x512xf32>
    %cst_29 = arith.constant dense<0.000000e+00> : vector<1xf32>
    %41 = vector.multi_reduction <add>, %40, %cst_29 [1] : vector<1x512xf32> to vector<1xf32>
    %42 = vector.shape_cast %41 : vector<1xf32> to vector<1x1xf32>
    %cst_30 = arith.constant 9.99999996E-13 : f32
    %43 = vector.broadcast %cst_30 : f32 to vector<1x1xf32>
    %44 = arith.addf %42, %43 : vector<1x1xf32>
    %45 = math.rsqrt %44 : vector<1x1xf32>
    %46 = vector.broadcast %45 : vector<1x1xf32> to vector<1x512xf32>
    %47 = arith.mulf %39, %46 : vector<1x512xf32>
    %c0_31 = arith.constant 0 : index
    %c0_32 = arith.constant 0 : index
    %c0_33 = arith.constant 0 : index
    %48 = vector.load %arg5[%c0_31, %c0_32, %c0_33] : memref<1x1x512xf32, #tpu.memory_space<vmem>>, vector<1x1x512xf32>
    %49 = vector.shape_cast %48 : vector<1x1x512xf32> to vector<1x512xf32>
    %50 = vector.shape_cast %47 : vector<1x512xf32> to vector<1x1x512xf32>
    tpu.vector_store %arg5[%c0_31, %c0_32, %c0_33], %50 {strides = array<i32>} : memref<1x1x512xf32, #tpu.memory_space<vmem>>, vector<1x1x512xf32>,
    return
  }
  func.func @transform_0(%arg0: i32) -> (i32, i32, i32) {
    %c0_i32 = arith.constant 0 : i32
    %c0_i32_0 = arith.constant 0 : i32
    %c0_i32_1 = arith.constant 0 : i32
    return %arg0, %c0_i32, %c0_i32_0 : i32, i32, i32
  }
  func.func @transform_1(%arg0: i32) -> (i32, i32) {
    %c0_i32 = arith.constant 0 : i32
    %c0_i32_0 = arith.constant 0 : i32
    %c0_i32_1 = arith.constant 0 : i32
    return %c0_i32, %c0_i32_0 : i32, i32
  }
  func.func @transform_2(%arg0: i32) -> (i32, i32) {
    %c0_i32 = arith.constant 0 : i32
    %c0_i32_0 = arith.constant 0 : i32
    %c0_i32_1 = arith.constant 0 : i32
    return %c0_i32, %c0_i32_0 : i32, i32
  }
  func.func @transform_3(%arg0: i32) -> (i32, i32, i32) {
    %c0_i32 = arith.constant 0 : i32
    %c0_i32_0 = arith.constant 0 : i32
    %c0_i32_1 = arith.constant 0 : i32
    %c0_i32_2 = arith.constant 0 : i32
    return %c0_i32, %c0_i32_0, %c0_i32_1 : i32, i32, i32
  }
  func.func @transform_4(%arg0: i32) -> (i32, i32, i32) {
    %c0_i32 = arith.constant 0 : i32
    %c0_i32_0 = arith.constant 0 : i32
    %c0_i32_1 = arith.constant 0 : i32
    return %arg0, %c0_i32, %c0_i32_0 : i32, i32, i32
  }
}

</mosaic_0001>

<bundles_post_ra>
// kernel: id_loss_forward.1
= control target key start
LH: loop header
LB: loop body
LE: loop exit
PB: predicated region body
PF: predicated region fallthrough
CT: control target
= control target key end

     0   :  { %s2504_s15 = smov 0   ;;  %s3097_s0 = inlined_call_operand.vmem [shape: f32[4,768,256], index: 0, kind: input, shape index: {}]   ;;  %s3098_s1 = inlined_call_operand.vmem [shape: f32[21,768], index: 1, kind: input, shape index: {}]   ;;  %s3099_s2 = inlined_call_operand.vmem [shape: f32[7,256], index: 2, kind: input, shape index: {}]   ;;  %s3100_s3 = inlined_call_operand.vmem [shape: f32[7,21,512], index: 3, kind: input, shape index: {}]   ;;  %s3101_s4 = inlined_call_operand.vmem [shape: f32[4,1,512], index: 4, kind: output, shape index: {}]  }
   0x1 LB: > { %s2045_s16 = sadd.s32 4294967295, %s2475_s15   ;;  %p2049_p0 = scmp.ge.s32.totalorder %s2475_s15, 1  ;;  %s2475_s15 = sphi %s2504_s15, %s14_s15  }
   0x2   : > { %p162_p1 = scmp.lt.s32.totalorder %s2475_s15, 5 }
   0x4   : > { %p163_p2 = pnand %p2049_p0, %p162_p1 }
   0x5   : > { %p187_p3 = scmp.lt.s32.totalorder (!%p163_p2), %s2045_s16, 3  ;;  %v391_v0 = vld [vmem:[%s3098_s1 + $0x18] sm:$0xff] (!%p163_p2)  ;;  %vm757_vm0 = vcmask (!%p163_p2), 1044480   ;;  %vm754_vm1 = vcmask (!%p163_p2), 171008   ;;  %vm1942_vm2 = vcmask (!%p163_p2), 1040384  }
   0x6   : > { %166 = sbr.rel (%p163_p2) target bundleno = 1052 (0x41c), region = 36  ;;  %553 = vmatprep.mubr.f32.mxu0 (!%p163_p2), %v391_v0 }
   0xd   : > { %s3103_s16 = smov (!%p187_p3, %s2045_s16), 3 }
   0xe   : > { %s2456_s19 = smul.u32 1536, %s3103_s16  ;;  %s2051_s11 = sshll.u32 %s3103_s16, 2 }
   0xf   : > { %s195_s14 = scalar_lea.vmem %s3101_s4, %s2051_s11 }
  0x10   : > { %s2521_s22 = scalar_lea.vmem %s3097_s0, %s2456_s19 }
  0x11   : > { %v261_v1 = vld [vmem:[%s2521_s22 + $0x208] sm:$0xff]  ;;  %v263_v2 = vld [vmem:[%s2521_s22 + $0x218] sm:$0xff]  ;;  %v260_v3 = vld [vmem:[%s2521_s22 + $0x200] sm:$0xff] }
  0x12   : > { %v2232_v4 = vpack.c.bf16 %v263_v2, %v261_v1  ;;  %v262_v5 = vld [vmem:[%s2521_s22 + $0x210] sm:$0xff]  ;;  %v265_v6 = vld [vmem:[%s2521_s22 + $0x228] sm:$0xff]  ;;  %v267_v7 = vld [vmem:[%s2521_s22 + $0x238] sm:$0xff] }
  0x13   : > { %v2234_v8 = vpack.c.bf16 %v262_v5, %v260_v3  ;;  %v2236_v9 = vpack.c.bf16 %v267_v7, %v265_v6  ;;  %v264_v10 = vld [vmem:[%s2521_s22 + $0x220] sm:$0xff]  ;;  %v266_v11 = vld [vmem:[%s2521_s22 + $0x230] sm:$0xff]  ;;  %v269_v12 = vld [vmem:[%s2521_s22 + $0x248] sm:$0xff] }
  0x14   : > { %2233 = vmatprep.subr.bf16.mxu0 %v2232_v4  ;;  %v271_v13 = vld [vmem:[%s2521_s22 + $0x258] sm:$0xff]  ;;  %v2238_v14 = vpack.c.bf16 %v266_v11, %v264_v10  ;;  %v268_v16 = vld [vmem:[%s2521_s22 + $0x240] sm:$0xff]  ;;  %v270_v17 = vld [vmem:[%s2521_s22 + $0x250] sm:$0xff] }
  0x15   : > { %2235 = vmatpush1.bf16.msra.mxu0 %v2234_v8  ;;  %v2240_v15 = vpack.c.bf16 %v271_v13, %v269_v12  ;;  %v273_v18 = vld [vmem:[%s2521_s22 + $0x268] sm:$0xff]  ;;  %v275_v19 = vld [vmem:[%s2521_s22 + $0x278] sm:$0xff]  ;;  %v2242_v20 = vpack.c.bf16 %v270_v17, %v268_v16  ;;  %v272_v22 = vld [vmem:[%s2521_s22 + $0x260] sm:$0xff] }
  0x16   : > { %2237 = vmatprep.subr.bf16.mxu0 %v2236_v9  ;;  %v2244_v21 = vpack.c.bf16 %v275_v19, %v273_v18  ;;  %v274_v23 = vld [vmem:[%s2521_s22 + $0x270] sm:$0xff]  ;;  %v277_v24 = vld [vmem:[%s2521_s22 + $0x288] sm:$0xff]  ;;  %v279_v25 = vld [vmem:[%s2521_s22 + $0x298] sm:$0xff] }
  0x17   : > { %v2246_v26 = vpack.c.bf16 %v274_v23, %v272_v22  ;;  %v2248_v27 = vpack.c.bf16 %v279_v25, %v277_v24  ;;  %v276_v28 = vld [vmem:[%s2521_s22 + $0x280] sm:$0xff]  ;;  %v278_v29 = vld [vmem:[%s2521_s22 + $0x290] sm:$0xff]  ;;  %v281_v30 = vld [vmem:[%s2521_s22 + $0x2a8] sm:$0xff] }
  0x18   : > { %v283_v31 = vld [vmem:[%s2521_s22 + $0x2b8] sm:$0xff]  ;;  %v2250_v32 = vpack.c.bf16 %v278_v29, %v276_v28  ;;  %v280_v34 = vld [vmem:[%s2521_s22 + $0x2a0] sm:$0xff]  ;;  %v282_v35 = vld [vmem:[%s2521_s22 + $0x2b0] sm:$0xff] }
  0x19   : > { %2239 = vmatpush1.bf16.msra.mxu0 %v2238_v14  ;;  %v2252_v33 = vpack.c.bf16 %v283_v31, %v281_v30  ;;  %v285_v36 = vld [vmem:[%s2521_s22 + $0x2c8] sm:$0xff]  ;;  %v287_v37 = vld [vmem:[%s2521_s22 + $0x2d8] sm:$0xff]  ;;  %v2254_v38 = vpack.c.bf16 %v282_v35, %v280_v34  ;;  %v284_v39 = vld [vmem:[%s2521_s22 + $0x2c0] sm:$0xff] }
  0x1a   : > { %2241 = vmatprep.subr.bf16.mxu0 %v2240_v15  ;;  %v286_v40 = vld [vmem:[%s2521_s22 + $0x2d0] sm:$0xff]  ;;  %v2256_v41 = vpack.c.bf16 %v287_v37, %v285_v36  ;;  %v289_v42 = vld [vmem:[%s2521_s22 + $0x2e8] sm:$0xff]  ;;  %v199_v44 = vld [vmem:[%s2521_s22 + $0x18] sm:$0xff] }
  0x1b   : > { %v197_v43 = vld [vmem:[%s2521_s22 + $0x8] sm:$0xff]  ;;  %v291_v45 = vld [vmem:[%s2521_s22 + $0x2f8] sm:$0xff]  ;;  %v196_v47 = vld [vmem:[%s2521_s22] sm:$0xff]  ;;  %v2258_v50 = vpack.c.bf16 %v286_v40, %v284_v39 }
  0x1c   : > { %v2168_v46 = vpack.c.bf16 %v199_v44, %v197_v43  ;;  %v198_v48 = vld [vmem:[%s2521_s22 + $0x10] sm:$0xff]  ;;  %v201_v51 = vld [vmem:[%s2521_s22 + $0x28] sm:$0xff]  ;;  %v203_v52 = vld [vmem:[%s2521_s22 + $0x38] sm:$0xff]  ;;  %v2260_v54 = vpack.c.bf16 %v291_v45, %v289_v42 }
  0x1d   : > { %2243 = vmatpush1.bf16.msra.mxu0 %v2242_v20  ;;  %v2170_v49 = vpack.c.bf16 %v198_v48, %v196_v47  ;;  %v200_v53 = vld [vmem:[%s2521_s22 + $0x20] sm:$0xff]  ;;  %v290_v56 = vld [vmem:[%s2521_s22 + $0x2f0] sm:$0xff]  ;;  %v2172_v57 = vpack.c.bf16 %v203_v52, %v201_v51  ;;  %v293_v59 = vld [vmem:[%s2521_s22 + $0x308] sm:$0xff] }
  0x1e   : > { %2245 = vmatprep.subr.bf16.mxu0 %v2244_v21  ;;  %2169 = vmatprep.subr.bf16.mxu1 %v2168_v46  ;;  %v288_v55 = vld [vmem:[%s2521_s22 + $0x2e0] sm:$0xff]  ;;  %v202_v58 = vld [vmem:[%s2521_s22 + $0x30] sm:$0xff]  ;;  %v295_v60 = vld [vmem:[%s2521_s22 + $0x318] sm:$0xff] }
  0x1f   : > { %2171 = vmatpush1.bf16.msra.mxu1 %v2170_v49  ;;  %v2174_v61 = vpack.c.bf16 %v202_v58, %v200_v53  ;;  %v205_v62 = vld [vmem:[%s2521_s22 + $0x48] sm:$0xff]  ;;  %v207_v63 = vld [vmem:[%s2521_s22 + $0x58] sm:$0xff]  ;;  %v204_v0 = vld [vmem:[%s2521_s22 + $0x40] sm:$0xff]  ;;  %v2262_v2 = vpack.c.bf16 %v290_v56, %v288_v55  ;;  %v2264_v6 = vpack.c.bf16 %v295_v60, %v293_v59 }
  0x20   : > { %2173 = vmatprep.subr.bf16.mxu1 %v2172_v57  ;;  %v206_v1 = vld [vmem:[%s2521_s22 + $0x50] sm:$0xff]  ;;  %v292_v3 = vld [vmem:[%s2521_s22 + $0x300] sm:$0xff]  ;;  %v2176_v5 = vpack.c.bf16 %v207_v63, %v205_v62  ;;  %v297_v7 = vld [vmem:[%s2521_s22 + $0x328] sm:$0xff] }
  0x21   : > { %2247 = vmatpush1.bf16.msra.mxu0 %v2246_v26  ;;  %v294_v4 = vld [vmem:[%s2521_s22 + $0x310] sm:$0xff]  ;;  %v2178_v8 = vpack.c.bf16 %v206_v1, %v204_v0  ;;  %v209_v9 = vld [vmem:[%s2521_s22 + $0x68] sm:$0xff]  ;;  %v211_v10 = vld [vmem:[%s2521_s22 + $0x78] sm:$0xff] }
  0x22   : > { %2249 = vmatprep.subr.bf16.mxu0 %v2248_v27  ;;  %v299_v11 = vld [vmem:[%s2521_s22 + $0x338] sm:$0xff]  ;;  %v2180_v12 = vpack.c.bf16 %v211_v10, %v209_v9  ;;  %v208_v13 = vld [vmem:[%s2521_s22 + $0x60] sm:$0xff]  ;;  %v210_v14 = vld [vmem:[%s2521_s22 + $0x70] sm:$0xff]  ;;  %v2266_v15 = vpack.c.bf16 %v294_v4, %v292_v3 }
  0x23   : > { %2175 = vmatpush1.bf16.msra.mxu1 %v2174_v61  ;;  %v213_v16 = vld [vmem:[%s2521_s22 + $0x88] sm:$0xff]  ;;  %v215_v17 = vld [vmem:[%s2521_s22 + $0x98] sm:$0xff]  ;;  %v2268_v18 = vpack.c.bf16 %v299_v11, %v297_v7  ;;  %v296_v19 = vld [vmem:[%s2521_s22 + $0x320] sm:$0xff]  ;;  %v2182_v22 = vpack.c.bf16 %v210_v14, %v208_v13 }
  0x24   : > { %2177 = vmatprep.subr.bf16.mxu1 %v2176_v5  ;;  %v298_v20 = vld [vmem:[%s2521_s22 + $0x330] sm:$0xff]  ;;  %v301_v21 = vld [vmem:[%s2521_s22 + $0x348] sm:$0xff]  ;;  %v303_v23 = vld [vmem:[%s2521_s22 + $0x358] sm:$0xff]  ;;  %v2184_v24 = vpack.c.bf16 %v215_v17, %v213_v16 }
  0x25   : > { %2251 = vmatpush1.bf16.msra.mxu0 %v2250_v32  ;;  %v212_v25 = vld [vmem:[%s2521_s22 + $0x80] sm:$0xff]  ;;  %v214_v26 = vld [vmem:[%s2521_s22 + $0x90] sm:$0xff]  ;;  %v217_v27 = vld [vmem:[%s2521_s22 + $0xa8] sm:$0xff]  ;;  %v2270_v29 = vpack.c.bf16 %v298_v20, %v296_v19  ;;  %v2272_v30 = vpack.c.bf16 %v303_v23, %v301_v21 }
  0x26   : > { %2253 = vmatprep.subr.bf16.mxu0 %v2252_v33  ;;  %v219_v28 = vld [vmem:[%s2521_s22 + $0xb8] sm:$0xff]  ;;  %v300_v31 = vld [vmem:[%s2521_s22 + $0x340] sm:$0xff]  ;;  %v302_v32 = vld [vmem:[%s2521_s22 + $0x350] sm:$0xff]  ;;  %v2186_v34 = vpack.c.bf16 %v214_v26, %v212_v25 }
  0x27   : > { %2179 = vmatpush1.bf16.msra.mxu1 %v2178_v8  ;;  %v305_v33 = vld [vmem:[%s2521_s22 + $0x368] sm:$0xff]  ;;  %v307_v35 = vld [vmem:[%s2521_s22 + $0x378] sm:$0xff]  ;;  %v2188_v36 = vpack.c.bf16 %v219_v28, %v217_v27  ;;  %v216_v37 = vld [vmem:[%s2521_s22 + $0xa0] sm:$0xff] }
  0x28   : > { %2181 = vmatprep.subr.bf16.mxu1 %v2180_v12  ;;  %v221_v39 = vld [vmem:[%s2521_s22 + $0xc8] sm:$0xff]  ;;  %v223_v40 = vld [vmem:[%s2521_s22 + $0xd8] sm:$0xff]  ;;  %v2276_v42 = vpack.c.bf16 %v307_v35, %v305_v33  ;;  %v304_v43 = vld [vmem:[%s2521_s22 + $0x360] sm:$0xff] }
  0x29   : > { %2255 = vmatpush1.bf16.msra.mxu0 %v2254_v38  ;;  %v218_v38 = vld [vmem:[%s2521_s22 + $0xb0] sm:$0xff]  ;;  %v309_v45 = vld [vmem:[%s2521_s22 + $0x388] sm:$0xff]  ;;  %v311_v47 = vld [vmem:[%s2521_s22 + $0x398] sm:$0xff]  ;;  %v2192_v48 = vpack.c.bf16 %v223_v40, %v221_v39 }
  0x2a   : > { %2257 = vmatprep.subr.bf16.mxu0 %v2256_v41  ;;  %v2274_v41 = vpack.c.bf16 %v302_v32, %v300_v31  ;;  %v306_v44 = vld [vmem:[%s2521_s22 + $0x370] sm:$0xff]  ;;  %v2190_v46 = vpack.c.bf16 %v218_v38, %v216_v37  ;;  %v220_v49 = vld [vmem:[%s2521_s22 + $0xc0] sm:$0xff]  ;;  %v225_v51 = vld [vmem:[%s2521_s22 + $0xe8] sm:$0xff] }
  0x2b   : > { %2183 = vmatpush1.bf16.msra.mxu1 %v2182_v22  ;;  %v227_v52 = vld [vmem:[%s2521_s22 + $0xf8] sm:$0xff]  ;;  %v2278_v53 = vpack.c.bf16 %v306_v44, %v304_v43  ;;  %v308_v55 = vld [vmem:[%s2521_s22 + $0x380] sm:$0xff]  ;;  %v310_v56 = vld [vmem:[%s2521_s22 + $0x390] sm:$0xff] }
  0x2c   : > { %2185 = vmatprep.subr.bf16.mxu1 %v2184_v24  ;;  %v313_v57 = vld [vmem:[%s2521_s22 + $0x3a8] sm:$0xff]  ;;  %v315_v59 = vld [vmem:[%s2521_s22 + $0x3b8] sm:$0xff]  ;;  %v2196_v60 = vpack.c.bf16 %v227_v52, %v225_v51  ;;  %v224_v61 = vld [vmem:[%s2521_s22 + $0xe0] sm:$0xff]  ;;  %v2282_v1 = vpack.c.bf16 %v310_v56, %v308_v55 }
  0x2d   : > { %2259 = vmatpush1.bf16.msra.mxu0 %v2258_v50  ;;  %v222_v50 = vld [vmem:[%s2521_s22 + $0xd0] sm:$0xff]  ;;  %v229_v63 = vld [vmem:[%s2521_s22 + $0x108] sm:$0xff]  ;;  %v231_v0 = vld [vmem:[%s2521_s22 + $0x118] sm:$0xff] }
  0x2e   : > { %2261 = vmatprep.subr.bf16.mxu0 %v2260_v54  ;;  %v2280_v54 = vpack.c.bf16 %v311_v47, %v309_v45  ;;  %v2194_v58 = vpack.c.bf16 %v222_v50, %v220_v49  ;;  %v226_v62 = vld [vmem:[%s2521_s22 + $0xf0] sm:$0xff]  ;;  %v312_v3 = vld [vmem:[%s2521_s22 + $0x3a0] sm:$0xff]  ;;  %v317_v5 = vld [vmem:[%s2521_s22 + $0x3c8] sm:$0xff]  ;;  %v2200_v8 = vpack.c.bf16 %v231_v0, %v229_v63 }
  0x2f   : > { %2187 = vmatpush1.bf16.msra.mxu1 %v2186_v34  ;;  %v314_v4 = vld [vmem:[%s2521_s22 + $0x3b0] sm:$0xff]  ;;  %v319_v7 = vld [vmem:[%s2521_s22 + $0x3d8] sm:$0xff]  ;;  %v228_v9 = vld [vmem:[%s2521_s22 + $0x100] sm:$0xff] }
  0x30   : > { %2189 = vmatprep.subr.bf16.mxu1 %v2188_v36  ;;  %v230_v10 = vld [vmem:[%s2521_s22 + $0x110] sm:$0xff]  ;;  %v233_v11 = vld [vmem:[%s2521_s22 + $0x128] sm:$0xff]  ;;  %v235_v12 = vld [vmem:[%s2521_s22 + $0x138] sm:$0xff]  ;;  %v2286_v13 = vpack.c.bf16 %v314_v4, %v312_v3  ;;  %v2288_v14 = vpack.c.bf16 %v319_v7, %v317_v5 }
  0x31   : > { %2263 = vmatpush1.bf16.msra.mxu0 %v2262_v2  ;;  %v2284_v2 = vpack.c.bf16 %v315_v59, %v313_v57  ;;  %v318_v16 = vld [vmem:[%s2521_s22 + $0x3d0] sm:$0xff]  ;;  %v321_v17 = vld [vmem:[%s2521_s22 + $0x3e8] sm:$0xff]  ;;  %v323_v19 = vld [vmem:[%s2521_s22 + $0x3f8] sm:$0xff]  ;;  %v2204_v20 = vpack.c.bf16 %v235_v12, %v233_v11 }
  0x32   : > { %2265 = vmatprep.subr.bf16.mxu0 %v2264_v6  ;;  %v2198_v6 = vpack.c.bf16 %v226_v62, %v224_v61  ;;  %v232_v21 = vld [vmem:[%s2521_s22 + $0x120] sm:$0xff]  ;;  %v234_v22 = vld [vmem:[%s2521_s22 + $0x130] sm:$0xff]  ;;  %v237_v23 = vld [vmem:[%s2521_s22 + $0x148] sm:$0xff]  ;;  %v2292_v26 = vpack.c.bf16 %v323_v19, %v321_v17 }
  0x33   : > { %2191 = vmatpush1.bf16.msra.mxu1 %v2190_v46  ;;  %v239_v24 = vld [vmem:[%s2521_s22 + $0x158] sm:$0xff]  ;;  %v320_v27 = vld [vmem:[%s2521_s22 + $0x3e0] sm:$0xff]  ;;  %v322_v28 = vld [vmem:[%s2521_s22 + $0x3f0] sm:$0xff] }
  0x34   : > { %2193 = vmatprep.subr.bf16.mxu1 %v2192_v48  ;;  %v327_v31 = vld [vmem:[%s2521_s22 + $0x418] sm:$0xff]  ;;  %v2208_v32 = vpack.c.bf16 %v239_v24, %v237_v23  ;;  %v236_v33 = vld [vmem:[%s2521_s22 + $0x140] sm:$0xff]  ;;  %v238_v34 = vld [vmem:[%s2521_s22 + $0x150] sm:$0xff]  ;;  %v2294_v37 = vpack.c.bf16 %v322_v28, %v320_v27 }
  0x35   : > { %2267 = vmatpush1.bf16.msra.mxu0 %v2266_v15  ;;  %v316_v15 = vld [vmem:[%s2521_s22 + $0x3c0] sm:$0xff]  ;;  %v241_v35 = vld [vmem:[%s2521_s22 + $0x168] sm:$0xff]  ;;  %v243_v36 = vld [vmem:[%s2521_s22 + $0x178] sm:$0xff] }
  0x36   : > { %2269 = vmatprep.subr.bf16.mxu0 %v2268_v18  ;;  %v2202_v18 = vpack.c.bf16 %v230_v10, %v228_v9  ;;  %v2290_v25 = vpack.c.bf16 %v318_v16, %v316_v15  ;;  %v324_v39 = vld [vmem:[%s2521_s22 + $0x400] sm:$0xff]  ;;  %v326_v40 = vld [vmem:[%s2521_s22 + $0x410] sm:$0xff]  ;;  %v331_v43 = vld [vmem:[%s2521_s22 + $0x438] sm:$0xff]  ;;  %v2212_v44 = vpack.c.bf16 %v243_v36, %v241_v35 }
  0x37   : > { %2195 = vmatpush1.bf16.msra.mxu1 %v2194_v58  ;;  %v240_v45 = vld [vmem:[%s2521_s22 + $0x160] sm:$0xff]  ;;  %v242_v46 = vld [vmem:[%s2521_s22 + $0x170] sm:$0xff]  ;;  %v245_v47 = vld [vmem:[%s2521_s22 + $0x188] sm:$0xff]  ;;  %v2298_v50 = vpack.c.bf16 %v326_v40, %v324_v39 }
  0x38   : > { %2197 = vmatprep.subr.bf16.mxu1 %v2196_v60  ;;  %v247_v48 = vld [vmem:[%s2521_s22 + $0x198] sm:$0xff]  ;;  %v390_v49 = vld [vmem:[%s3098_s1 + $0x10] sm:$0xff]  ;;  %v397_v51 = vld [vmem:[%s3098_s1 + $0x48] sm:$0xff]  ;;  %v2214_v57 = vpack.c.bf16 %v242_v46, %v240_v45 }
  0x39   : > { %2271 = vmatpush1.bf16.msra.mxu0 %v2270_v29  ;;  %v325_v29 = vld [vmem:[%s2521_s22 + $0x408] sm:$0xff]  ;;  %v330_v55 = vld [vmem:[%s2521_s22 + $0x430] sm:$0xff]  ;;  %v335_v58 = vld [vmem:[%s2521_s22 + $0x458] sm:$0xff]  ;;  %v2216_v59 = vpack.c.bf16 %v247_v48, %v245_v47 }
  0x3a   : > { %2273 = vmatprep.subr.bf16.mxu0 %v2272_v30  ;;  %v2206_v30 = vpack.c.bf16 %v234_v22, %v232_v21  ;;  %v2296_v38 = vpack.c.bf16 %v327_v31, %v325_v29  ;;  %v389_v52 = vld [vmem:[%s3098_s1 + $0x8] sm:$0xff]  ;;  %v244_v60 = vld [vmem:[%s2521_s22 + $0x180] sm:$0xff]  ;;  %v246_v61 = vld [vmem:[%s2521_s22 + $0x190] sm:$0xff] }
  0x3b   : > { %2199 = vmatpush1.bf16.msra.mxu1 %v2198_v6  ;;  %v333_v56 = vld [vmem:[%s2521_s22 + $0x448] sm:$0xff]  ;;  %470 = vmatprep.mubr.f32.mxu1 %v389_v52  ;;  %v251_v63 = vld [vmem:[%s2521_s22 + $0x1b8] sm:$0xff]  ;;  %v332_v4 = vld [vmem:[%s2521_s22 + $0x440] sm:$0xff]  ;;  %v2218_v7 = vpack.c.bf16 %v246_v61, %v244_v60 }
  0x3c   : > { %2201 = vmatprep.subr.bf16.mxu1 %v2200_v8  ;;  %v249_v62 = vld [vmem:[%s2521_s22 + $0x1a8] sm:$0xff]  ;;  %v2304_v3 = vpack.c.bf16 %v335_v58, %v333_v56  ;;  %v334_v5 = vld [vmem:[%s2521_s22 + $0x450] sm:$0xff]  ;;  %v339_v8 = vld [vmem:[%s2521_s22 + $0x478] sm:$0xff] }
  0x3d   : > { %2275 = vmatpush1.bf16.msra.mxu0 %v2274_v41  ;;  %v329_v41 = vld [vmem:[%s2521_s22 + $0x428] sm:$0xff]  ;;  %v2220_v9 = vpack.c.bf16 %v251_v63, %v249_v62  ;;  %v248_v10 = vld [vmem:[%s2521_s22 + $0x1a0] sm:$0xff]  ;;  %v250_v11 = vld [vmem:[%s2521_s22 + $0x1b0] sm:$0xff] }
  0x3e   : > { %2277 = vmatprep.subr.bf16.mxu0 %v2276_v42  ;;  %v2210_v42 = vpack.c.bf16 %v238_v34, %v236_v33  ;;  %v337_v6 = vld [vmem:[%s2521_s22 + $0x468] sm:$0xff]  ;;  %v336_v15 = vld [vmem:[%s2521_s22 + $0x460] sm:$0xff]  ;;  %v402_v16 = vld [vmem:[%s3098_s1 + $0x70] sm:$0x1f] }
  0x3f   : > { %2203 = vmatpush1.bf16.msra.mxu1 %v2202_v18  ;;  %v253_v12 = vld [vmem:[%s2521_s22 + $0x1c8] sm:$0xff]  ;;  %v2308_v17 = vpack.c.bf16 %v339_v8, %v337_v6  ;;  %v338_v18 = vld [vmem:[%s2521_s22 + $0x470] sm:$0xff]  ;;  %v343_v22 = vld [vmem:[%s2521_s22 + $0x498] sm:$0xff] }
  0x40   : > { %2205 = vmatprep.subr.bf16.mxu1 %v2204_v20  ;;  %v341_v19 = vld [vmem:[%s2521_s22 + $0x488] sm:$0xff]  ;;  %v2222_v20 = vpack.c.bf16 %v250_v11, %v248_v10  ;;  %v252_v24 = vld [vmem:[%s2521_s22 + $0x1c0] sm:$0xff]  ;;  %v259_v27 = vld [vmem:[%s2521_s22 + $0x1f8] sm:$0xff]  ;;  %v2310_v28 = vpack.c.bf16 %v338_v18, %v336_v15 }
  0x41   : > { %2279 = vmatpush1.bf16.msra.mxu0 %v2278_v53  ;;  %v2300_v53 = vpack.c.bf16 %v331_v43, %v329_v41  ;;  %v393_v21 = vld [vmem:[%s3098_s1 + $0x28] sm:$0xff]  ;;  %v2312_v29 = vpack.c.bf16 %v343_v22, %v341_v19  ;;  %v342_v31 = vld [vmem:[%s2521_s22 + $0x490] sm:$0xff]  ;;  %v347_v34 = vld [vmem:[%s2521_s22 + $0x4b8] sm:$0xff] }
  0x42   : > { %2281 = vmatprep.subr.bf16.mxu0 %v2280_v54  ;;  %v328_v54 = vld [vmem:[%s2521_s22 + $0x420] sm:$0xff]  ;;  %v346_v41 = vld [vmem:[%s2521_s22 + $0x4b0] sm:$0xff]  ;;  %v349_v43 = vld [vmem:[%s2521_s22 + $0x4c8] sm:$0xff] }
  0x43   : > { %2207 = vmatpush1.bf16.msra.mxu1 %v2206_v30  ;;  %v2302_v0 = vpack.c.bf16 %v330_v55, %v328_v54  ;;  %v340_v30 = vld [vmem:[%s2521_s22 + $0x480] sm:$0xff]  ;;  %v350_v48 = vld [vmem:[%s2521_s22 + $0x4d0] sm:$0xff]  ;;  %v395_v52 = vld [vmem:[%s3098_s1 + $0x38] sm:$0xff] }
  0x44   : > { %2209 = vmatprep.subr.bf16.mxu1 %v2208_v32  ;;  %v345_v32 = vld [vmem:[%s2521_s22 + $0x4a8] sm:$0xff]  ;;  %v256_v36 = vld [vmem:[%s2521_s22 + $0x1e0] sm:$0xff]  ;;  %v354_v56 = vld [vmem:[%s2521_s22 + $0x4f0] sm:$0xff] }
  0x45   : > { %2283 = vmatpush1.bf16.msra.mxu0 %v2282_v1  ;;  %v396_v1 = vld [vmem:[%s3098_s1 + $0x40] sm:$0xff]  ;;  %v2316_v39 = vpack.c.bf16 %v347_v34, %v345_v32  ;;  %v357_v58 = vld [vmem:[%s2521_s22 + $0x508] sm:$0xff]  ;;  %v371_v15 = vld [vmem:[%s2521_s22 + $0x578] sm:$0xff] }
  0x46   : > { %2285 = vmatprep.subr.bf16.mxu0 %v2284_v2  ;;  %v403_v2 = vld [vmem:[%s3098_s1 + $0x78] sm:$0x1f]  ;;  %v344_v40 = vld [vmem:[%s2521_s22 + $0x4a0] sm:$0xff]  ;;  %v401_v60 = vld [vmem:[%s3098_s1 + $0x68] sm:$0x1f] }
  0x47   : > { %2211 = vmatpush1.bf16.msra.mxu1 %v2210_v42  ;;  %v2318_v45 = vpack.c.bf16 %v346_v41, %v344_v40  ;;  %v348_v47 = vld [vmem:[%s2521_s22 + $0x4c0] sm:$0xff]  ;;  %v365_v8 = vld [vmem:[%s2521_s22 + $0x548] sm:$0xff]  ;;  %v370_v19 = vld [vmem:[%s2521_s22 + $0x570] sm:$0xff] }
  0x48   : > { %2213 = vmatprep.subr.bf16.mxu1 %v2212_v44  ;;  %v351_v44 = vld [vmem:[%s2521_s22 + $0x4d8] sm:$0xff]  ;;  %v352_v55 = vld [vmem:[%s2521_s22 + $0x4e0] sm:$0xff]  ;;  %v381_v32 = vld [vmem:[%s2521_s22 + $0x5c8] sm:$0xff] }
  0x49   : > { %2287 = vmatpush1.bf16.msra.mxu0 %v2286_v13  ;;  %v255_v13 = vld [vmem:[%s2521_s22 + $0x1d8] sm:$0xff]  ;;  %v2320_v46 = vpack.c.bf16 %v351_v44, %v349_v43  ;;  %v2326_v61 = vpack.c.bf16 %v354_v56, %v352_v55  ;;  %v356_v63 = vld [vmem:[%s2521_s22 + $0x500] sm:$0xff]  ;;  %v386_v43 = vld [vmem:[%s2521_s22 + $0x5f0] sm:$0xff] }
  0x4a   : > { %2289 = vmatprep.subr.bf16.mxu0 %v2288_v14  ;;  %v2306_v14 = vpack.c.bf16 %v334_v5, %v332_v4  ;;  %v2224_v23 = vpack.c.bf16 %v255_v13, %v253_v12  ;;  %v360_v6 = vld [vmem:[%s2521_s22 + $0x520] sm:$0xff]  ;;  %v366_v13 = vld [vmem:[%s2521_s22 + $0x550] sm:$0xff] }
  0x4b   : > { %2215 = vmatpush1.bf16.msra.mxu1 %v2214_v57  ;;  %v394_v57 = vld [vmem:[%s3098_s1 + $0x30] sm:$0xff]  ;;  %v364_v12 = vld [vmem:[%s2521_s22 + $0x540] sm:$0xff] }
  0x4c   : > { %2217 = vmatprep.subr.bf16.mxu1 %v2216_v59  ;;  %v359_v59 = vld [vmem:[%s2521_s22 + $0x518] sm:$0xff]  ;;  %v368_v18 = vld [vmem:[%s2521_s22 + $0x560] sm:$0xff]  ;;  %v2058_v55 = vld [vmem:[%s3100_s3 + $0x90] sm:$0xff] }
  0x4d   : > { %2291 = vmatpush1.bf16.msra.mxu0 %v2290_v25  ;;  %v254_v25 = vld [vmem:[%s2521_s22 + $0x1d0] sm:$0xff]  ;;  %v2328_v62 = vpack.c.bf16 %v359_v59, %v357_v58  ;;  %v2342_v22 = vpack.c.bf16 %v370_v19, %v368_v18  ;;  %v2056_v18 = vld [vmem:[%s3100_s3 + $0x80] sm:$0xff] }
  0x4e   : > { %2293 = vmatprep.subr.bf16.mxu0 %v2292_v26  ;;  %v257_v26 = vld [vmem:[%s2521_s22 + $0x1e8] sm:$0xff]  ;;  %v2226_v33 = vpack.c.bf16 %v254_v25, %v252_v24  ;;  %v372_v24 = vld [vmem:[%s2521_s22 + $0x580] sm:$0xff]  ;;  %v374_v25 = vld [vmem:[%s2521_s22 + $0x590] sm:$0xff] }
  0x4f   : > { %2219 = vmatpush1.bf16.msra.mxu1 %v2218_v7  ;;  %v2228_v35 = vpack.c.bf16 %v259_v27, %v257_v26  ;;  %v362_v7 = vld [vmem:[%s2521_s22 + $0x530] sm:$0xff]  ;;  %v377_v26 = vld [vmem:[%s2521_s22 + $0x5a8] sm:$0xff]  ;;  %v379_v27 = vld [vmem:[%s2521_s22 + $0x5b8] sm:$0xff] }
  0x50   : > { %2221 = vmatprep.subr.bf16.mxu1 %v2220_v9  ;;  %v367_v9 = vld [vmem:[%s2521_s22 + $0x558] sm:$0xff]  ;;  %v2334_v10 = vpack.c.bf16 %v362_v7, %v360_v6  ;;  %v655_v19 = vld [vmem:[%s3099_s2] sm:$0x7f] }
  0x51   : > { %2295 = vmatpush1.bf16.msra.mxu0 %v2294_v37  ;;  %v258_v37 = vld [vmem:[%s2521_s22 + $0x1f0] sm:$0xff]  ;;  %v2336_v11 = vpack.c.bf16 %v367_v9, %v365_v8 }
  0x52   : > { %2297 = vmatprep.subr.bf16.mxu0 %v2296_v38  ;;  %v2314_v38 = vpack.c.bf16 %v342_v31, %v340_v30  ;;  %v2230_v42 = vpack.c.bf16 %v258_v37, %v256_v36  ;;  %v376_v30 = vld [vmem:[%s2521_s22 + $0x5a0] sm:$0xff]  ;;  %v378_v31 = vld [vmem:[%s2521_s22 + $0x5b0] sm:$0xff] }
  0x53   : > { %2223 = vmatpush1.bf16.msra.mxu1 %v2222_v20  ;;  %v373_v20 = vld [vmem:[%s2521_s22 + $0x588] sm:$0xff]  ;;  %v2350_v34 = vpack.c.bf16 %v378_v31, %v376_v30  ;;  %v380_v36 = vld [vmem:[%s2521_s22 + $0x5c0] sm:$0xff]  ;;  %v382_v37 = vld [vmem:[%s2521_s22 + $0x5d0] sm:$0xff] }
  0x54   : > { %554 = vmatmul.mubr.f32.vlgmr.msra.gmra.mrb[0].mxu0 %v390_v49  ;;  %2225 = vmatprep.subr.bf16.mxu1 %v2224_v23  ;;  %v388_v49 = vld [vmem:[%s3098_s1] sm:$0xff]  ;;  %v2354_v40 = vpack.c.bf16 %v382_v37, %v380_v36  ;;  %v734_v36 = vld [vmem:[%s3100_s3 + $0x38] sm:$0xff]  ;;  %v729_v37 = vld [vmem:[%s3100_s3 + $0x10] sm:$0xff] }
  0x55   : > { %2299 = vmatpush1.bf16.msra.mxu0 %v2298_v50  ;;  %559 = vmatprep.mubr.f32.mxu0 %v397_v51  ;;  %v353_v50 = vld [vmem:[%s2521_s22 + $0x4e8] sm:$0xff]  ;;  %v355_v51 = vld [vmem:[%s2521_s22 + $0x4f8] sm:$0xff] }
  0x56   : > { %2301 = vmatprep.subr.bf16.mxu0 %v2300_v53  ;;  %v2322_v53 = vpack.c.bf16 %v350_v48, %v348_v47  ;;  %v2324_v54 = vpack.c.bf16 %v355_v51, %v353_v50  ;;  %v398_v47 = vld [vmem:[%s3098_s1 + $0x50] sm:$0xff]  ;;  %v405_v48 = vld [vmem:[%s3098_s1 + $0x88] sm:$0x1f]  ;;  %v2055_v51 = vld [vmem:[%s3100_s3 + $0x78] sm:$0xff] }
  0x57   : > { %2227 = vmatpush1.bf16.msra.mxu1 %v2226_v33  ;;  %v383_v33 = vld [vmem:[%s2521_s22 + $0x5d8] sm:$0xff]  ;;  %v656_v50 = vld [vmem:[%s3099_s2 + $0x8] sm:$0x7f] }
  0x58   : > { %560 = vmatmul.mubr.f32.gmra.mrb[2].mxu0 %v396_v1  ;;  %2229 = vmatprep.subr.bf16.mxu1 %v2228_v35  ;;  %v400_v1 = vld [vmem:[%s3098_s1 + $0x60] sm:$0x1f]  ;;  %v2352_v35 = vpack.c.bf16 %v383_v33, %v381_v32 }
  0x59   : > { %2303 = vmatpush1.bf16.msra.mxu0 %v2302_v0  ;;  %565 = vmatprep.mubr.f32.mxu0 %v403_v2  ;;  %v358_v0 = vld [vmem:[%s2521_s22 + $0x510] sm:$0xff]  ;;  %v361_v2 = vld [vmem:[%s2521_s22 + $0x528] sm:$0xff] }
  0x5a   : > { %2305 = vmatprep.subr.bf16.mxu0 %v2304_v3  ;;  %v363_v3 = vld [vmem:[%s2521_s22 + $0x538] sm:$0xff]  ;;  %v2330_v4 = vpack.c.bf16 %v358_v0, %v356_v63 }
  0x5b   : > { %2231 = vmatpush1.bf16.msra.mxu1 %v2230_v42  ;;  %v2332_v5 = vpack.c.bf16 %v363_v3, %v361_v2  ;;  %v384_v42 = vld [vmem:[%s2521_s22 + $0x5e0] sm:$0xff] }
  0x5c   : > { %566 = vmatmul.mubr.f32.gmra.mrb[4].mxu0 %v402_v16  ;;  %v2338_v16 = vpack.c.bf16 %v366_v13, %v364_v12  ;;  %v2358_v44 = vpack.c.bf16 %v386_v43, %v384_v42  ;;  %v738_v42 = vld [vmem:[%s3100_s3 + $0x58] sm:$0x1f]  ;;  %v2077_v43 = vld [vmem:[%s3100_s3 + $0xc8] sm:$0xff] }
  0x5d   : > { %2307 = vmatpush1.bf16.msra.mxu0 %v2306_v14  ;;  %636 = vmatprep.mubr.f32.mxu0 %v393_v21  ;;  %v369_v14 = vld [vmem:[%s2521_s22 + $0x568] sm:$0xff]  ;;  %v375_v21 = vld [vmem:[%s2521_s22 + $0x598] sm:$0xff] }
  0x5e   : > { %2309 = vmatprep.subr.bf16.mxu0 %v2308_v17  ;;  %471 = vmatmul.mubr.f32.vlgmr.msra.gmra.mrb[0].mxu1 %v388_v49  ;;  %v2340_v17 = vpack.c.bf16 %v371_v15, %v369_v14  ;;  %v2344_v23 = vpack.c.bf16 %v375_v21, %v373_v20  ;;  %v404_v49 = vld [vmem:[%s3098_s1 + $0x80] sm:$0x1f]  ;;  %v2053_v14 = vld [vmem:[%s3100_s3 + $0x68] sm:$0xff] }
  0x5f   : > { %476 = vmatprep.mubr.f32.mxu1 %v395_v52  ;;  %v2059_v52 = vld [vmem:[%s3100_s3 + $0x98] sm:$0xff]  ;;  %v2057_v15 = vld [vmem:[%s3100_s3 + $0x88] sm:$0xff] }
  0x60   : > { %v728_v21 = vld [vmem:[%s3100_s3 + $0x8] sm:$0xff] }
  0x61   : > { %2311 = vmatpush1.bf16.msra.mxu0 %v2310_v28  ;;  %v2346_v28 = vpack.c.bf16 %v374_v25, %v372_v24  ;;  %v2061_v24 = vld [vmem:[%s3100_s3 + $0xa8] sm:$0x1f] }
  0x62   : > { %2313 = vmatprep.subr.bf16.mxu0 %v2312_v29  ;;  %477 = vmatmul.mubr.f32.gmra.mrb[2].mxu1 %v394_v57  ;;  %v2348_v29 = vpack.c.bf16 %v379_v27, %v377_v26  ;;  %v2063_v57 = vld [vmem:[%s3100_s3 + $0xb8] sm:$0x1f]  ;;  %v2060_v26 = vld [vmem:[%s3100_s3 + $0xa0] sm:$0x1f]  ;;  %v2477_v27 = vmov 0.0  }
  0x63   : > { %482 = vmatprep.mubr.f32.mxu1 %v401_v60 }
  0x65   : > { %2315 = vmatpush1.bf16.msra.mxu0 %v2314_v38  ;;  %v385_v38 = vld [vmem:[%s2521_s22 + $0x5e8] sm:$0xff] }
  0x66   : > { %2317 = vmatprep.subr.bf16.mxu0 %v2316_v39  ;;  %483 = vmatmul.mubr.f32.gmra.mrb[4].mxu1 %v400_v1  ;;  %v387_v39 = vld [vmem:[%s2521_s22 + $0x5f8] sm:$0xff] }
  0x67   : > { %v2356_v41 = vpack.c.bf16 %v387_v39, %v385_v38  ;;  %905 = vmatprep.mubr.f32.mxu1 %v2477_v27  ;;  %v733_v38 = vld [vmem:[%s3100_s3 + $0x30] sm:$0xff]  ;;  %v735_v39 = vld [vmem:[%s3100_s3 + $0x40] sm:$0x1f] }
  0x69   : > { %2319 = vmatpush1.bf16.msra.mxu0 %v2318_v45  ;;  %v392_v45 = vld [vmem:[%s3098_s1 + $0x20] sm:$0xff] }
  0x6a   : > { %2321 = vmatprep.subr.bf16.mxu0 %v2320_v46  ;;  %v399_v46 = vld [vmem:[%s3098_s1 + $0x58] sm:$0xff] }
  0x6d   : > { %2323 = vmatpush1.bf16.msra.mxu0 %v2322_v53  ;;  %v2054_v53 = vld [vmem:[%s3100_s3 + $0x70] sm:$0xff] }
  0x6e   : > { %2325 = vmatprep.subr.bf16.mxu0 %v2324_v54  ;;  %v2368_v54 = vpack.c.bf16 %v2059_v52, %v2055_v51  ;;  %v2370_v56 = vpack.c.bf16 %v2058_v55, %v2054_v53  ;;  %v2079_v51 = vld [vmem:[%s3100_s3 + $0xd8] sm:$0xff]  ;;  %v2078_v53 = vld [vmem:[%s3100_s3 + $0xd0] sm:$0xff]  ;;  %v2084_v55 = vld [vmem:[%s3100_s3 + $0x100] sm:$0x1f] }
  0x6f   : > { %v2083_v52 = vld [vmem:[%s3100_s3 + $0xf8] sm:$0xff] }
  0x70   : > { %2369 = vmatprep.subr.bf16.mxu1 %v2368_v54  ;;  %v2082_v54 = vld [vmem:[%s3100_s3 + $0xf0] sm:$0xff] }
  0x71   : > { %2327 = vmatpush1.bf16.msra.mxu0 %v2326_v61  ;;  %2371 = vmatpush1.bf16.msra.mxu1 %v2370_v56  ;;  %v2384_v56 = vpack.c.bf16 %v2083_v52, %v2079_v51  ;;  %v2148_v51 = vld [vmem:[%s3100_s3 + $0x240] sm:$0xff] }
  0x72   : > { %2329 = vmatprep.subr.bf16.mxu0 %v2328_v62  ;;  %2067 = vmatprep.subr.msk.mxu1 %vm757_vm0, %v2063_v57  ;;  %v2386_v57 = vpack.c.bf16 %v2082_v54, %v2078_v53  ;;  %v2152_v52 = vld [vmem:[%s3100_s3 + $0x260] sm:$0xff]  ;;  %v2140_v53 = vld [vmem:[%s3100_s3 + $0x230] sm:$0x1f] }
  0x75   : > { %2331 = vmatpush1.bf16.msra.mxu0 %v2330_v4 }
  0x76   : > { %2333 = vmatprep.subr.bf16.mxu0 %v2332_v5 }
  0x79   : > { %2335 = vmatpush1.bf16.msra.mxu0 %v2334_v10 }
  0x7a   : > { %2337 = vmatprep.subr.bf16.mxu0 %v2336_v11 }
  0x7d   : > { %2339 = vmatpush1.bf16.msra.mxu0 %v2338_v16  ;;  %v2364_v16 = vpack.c.bf16 %v2057_v15, %v2053_v14  ;;  %v2117_v14 = vld [vmem:[%s3100_s3 + $0x1a8] sm:$0xff]  ;;  %v2112_v15 = vld [vmem:[%s3100_s3 + $0x180] sm:$0xff] }
  0x7e   : > { %2341 = vmatprep.subr.bf16.mxu0 %v2340_v17  ;;  %v2052_v17 = vld [vmem:[%s3100_s3 + $0x60] sm:$0xff] }
  0x7f   : > { %v2366_v20 = vpack.c.bf16 %v2056_v18, %v2052_v17  ;;  %v2104_v17 = vld [vmem:[%s3100_s3 + $0x170] sm:$0x1f] }
  0x81   : > { %2343 = vmatpush1.bf16.msra.mxu0 %v2342_v22  ;;  %v732_v22 = vld [vmem:[%s3100_s3 + $0x28] sm:$0xff] }
  0x82   : > { %2345 = vmatprep.subr.bf16.mxu0 %v2344_v23  ;;  %v2062_v23 = vld [vmem:[%s3100_s3 + $0xb0] sm:$0x1f]  ;;  %v2372_v25 = vpack.c.bf16 %v732_v22, %v728_v21  ;;  %v2115_v21 = vld [vmem:[%s3100_s3 + $0x198] sm:$0xff] }
  0x83   : > { %2068 = vmatpush1.msk.msra.mxu1 %vm757_vm0, %v2062_v23  ;;  %v2119_v22 = vld [vmem:[%s3100_s3 + $0x1b8] sm:$0xff]  ;;  %v2114_v23 = vld [vmem:[%s3100_s3 + $0x190] sm:$0xff] }
  0x84   : > { %2373 = vmatprep.subr.bf16.mxu1 %v2372_v25  ;;  %v2120_v25 = vld [vmem:[%s3100_s3 + $0x1c0] sm:$0x1f] }
  0x85   : > { %2347 = vmatpush1.bf16.msra.mxu0 %v2346_v28  ;;  %v727_v28 = vld [vmem:[%s3100_s3] sm:$0xff] }
  0x86   : > { %2349 = vmatprep.subr.bf16.mxu0 %v2348_v29  ;;  %v731_v29 = vld [vmem:[%s3100_s3 + $0x20] sm:$0xff] }
  0x87   : > { %v2374_v31 = vpack.c.bf16 %v731_v29, %v727_v28 }
  0x89   : > { %2351 = vmatpush1.bf16.msra.mxu0 %v2350_v34  ;;  %v736_v34 = vld [vmem:[%s3100_s3 + $0x48] sm:$0x1f] }
  0x8a   : > { %2353 = vmatprep.subr.bf16.mxu0 %v2352_v35  ;;  %v730_v35 = vld [vmem:[%s3100_s3 + $0x18] sm:$0xff] }
  0x8d   : > { %2355 = vmatpush1.bf16.msra.mxu0 %v2354_v40  ;;  %v2376_v40 = vpack.c.bf16 %v734_v36, %v730_v35  ;;  %v2134_v35 = vld [vmem:[%s3100_s3 + $0x200] sm:$0xff]  ;;  %v2122_v36 = vld [vmem:[%s3100_s3 + $0x1d0] sm:$0x1f] }
  0x8e   : > { %2357 = vmatprep.subr.bf16.mxu0 %v2356_v41  ;;  %v2378_v41 = vpack.c.bf16 %v733_v38, %v729_v37 }
  0x91   : > { %2359 = vmatpush1.bf16.msra.mxu0 %v2358_v44  ;;  %v2081_v44 = vld [vmem:[%s3100_s3 + $0xe8] sm:$0xff] }
  0x94   : > { %637 = vmatmul.mubr.f32.vlgmr.msra.gmra.mrb[0].mxu0 %v392_v45  ;;  %v2076_v45 = vld [vmem:[%s3100_s3 + $0xc0] sm:$0xff] }
  0x95   : > { %642 = vmatprep.mubr.f32.mxu0 %v399_v46  ;;  %v2080_v46 = vld [vmem:[%s3100_s3 + $0xe0] sm:$0xff] }
  0x98   : > { %643 = vmatmul.mubr.f32.gmra.mrb[2].mxu0 %v398_v47  ;;  %v737_v47 = vld [vmem:[%s3100_s3 + $0x50] sm:$0x1f] }
  0x99   : > { %648 = vmatprep.mubr.f32.mxu0 %v405_v48  ;;  %v2380_v48 = vpack.c.bf16 %v2081_v44, %v2077_v43  ;;  %v2136_v43 = vld [vmem:[%s3100_s3 + $0x210] sm:$0xff]  ;;  %v2138_v44 = vld [vmem:[%s3100_s3 + $0x220] sm:$0x1f] }
  0x9c   : > { %649 = vmatmul.mubr.f32.gmra.mrb[4].mxu0 %v404_v49  ;;  %v2382_v49 = vpack.c.bf16 %v2080_v46, %v2076_v45 }
  0x9d   : > { %721 = vmatprep.mubr.f32.mxu0 %v656_v50  ;;  %v2085_v50 = vld [vmem:[%s3100_s3 + $0x108] sm:$0x1f] }
 0x131   : > { %v472_v58 = vpop.f32.mrb[0].mxu1 }
 0x132   : > { %v474_v59 = vpop.f32.mrb[1].mxu1 }
 0x135   : > { %v478_v60 = vpop.f32.mrb[2].mxu1 }
 0x136   : > { %v480_v61 = vpop.f32.mrb[3].mxu1 }
 0x139   : > { %v484_v62 = vpop.f32.mrb[4].mxu1 }
 0x13a   : > { %v486_v63 = vpop.f32.mrb[5].mxu1 }
 0x167   : > { %v638_v0 = vpop.f32.mrb[0].mxu0 }
 0x168   : > { %v2420_v1 = vadd.f32 %v638_v0, %v472_v58  ;;  %v640_v2 = vpop.f32.mrb[1].mxu0  ;;  %v2086_v0 = vld [vmem:[%s3100_s3 + $0x110] sm:$0x1f] }
 0x169   : > { %v2421_v3 = vadd.f32 %v640_v2, %v474_v59  ;;  %v2087_v59 = vld [vmem:[%s3100_s3 + $0x118] sm:$0x1f] }
 0x16b   : > { %v644_v4 = vpop.f32.mrb[2].mxu0 }
 0x16c   : > { %v2422_v5 = vadd.f32 %v644_v4, %v478_v60  ;;  %v646_v6 = vpop.f32.mrb[3].mxu0  ;;  %v2095_v60 = vld [vmem:[%s3100_s3 + $0x128] sm:$0xff]  ;;  %v2097_v4 = vld [vmem:[%s3100_s3 + $0x138] sm:$0xff] }
 0x16d   : > { %v2423_v7 = vadd.f32 %v646_v6, %v480_v61  ;;  %v2099_v61 = vld [vmem:[%s3100_s3 + $0x148] sm:$0xff]  ;;  %v2096_v6 = vld [vmem:[%s3100_s3 + $0x130] sm:$0xff] }
 0x16e   : > { %v2362_v8 = vpack.c.bf16 %v2422_v5, %v2420_v1  ;;  %v2388_v1 = vpack.c.bf16 %v2099_v61, %v2095_v60  ;;  %v2101_v5 = vld [vmem:[%s3100_s3 + $0x158] sm:$0xff]  ;;  %v2154_v60 = vld [vmem:[%s3100_s3 + $0x270] sm:$0xff]  ;;  %v2156_v61 = vld [vmem:[%s3100_s3 + $0x280] sm:$0x1f] }
 0x16f   : > { %v2360_v9 = vpack.c.bf16 %v2423_v7, %v2421_v3  ;;  %v650_v10 = vpop.f32.mrb[4].mxu0  ;;  %v2103_v3 = vld [vmem:[%s3100_s3 + $0x168] sm:$0x1f]  ;;  %v2100_v7 = vld [vmem:[%s3100_s3 + $0x150] sm:$0xff] }
 0x170   : > { %v2424_v11 = vadd.f32 %v650_v10, %v484_v62  ;;  %v652_v12 = vpop.f32.mrb[5].mxu0  ;;  %v2094_v62 = vld [vmem:[%s3100_s3 + $0x120] sm:$0xff]  ;;  %v2394_v10 = vpack.c.bf16 %v2100_v7, %v2096_v6 }
 0x171   : > { %v2425_v13 = vadd.f32 %v652_v12, %v486_v63  ;;  %2361 = vmatprep.subr.bf16.mxu0 %v2360_v9  ;;  %v2098_v63 = vld [vmem:[%s3100_s3 + $0x140] sm:$0xff]  ;;  %v2392_v9 = vpack.c.bf16 %v2101_v5, %v2097_v4  ;;  %v2105_v12 = vld [vmem:[%s3100_s3 + $0x178] sm:$0x1f] }
 0x172   : > { %2363 = vmatpush1.bf16.xpose.msra.mxu0 %v2362_v8  ;;  %v2390_v2 = vpack.c.bf16 %v2098_v63, %v2094_v62  ;;  %v2102_v8 = vld [vmem:[%s3100_s3 + $0x160] sm:$0x1f] }
 0x173   : > { %661 = vmatprep.subr.mxu0 %v2425_v13  ;;  %v2113_v13 = vld [vmem:[%s3100_s3 + $0x188] sm:$0xff] }
 0x174   : > { %v2396_v18 = vpack.c.bf16 %v2117_v14, %v2113_v13 }
 0x17a   : > { %662 = vmatpush1.xpose.msra.mxu0 %v2424_v11 }
 0x17b   : > { %2365 = vmatprep.subr.bf16.mxu0 %v2364_v16  ;;  %v2116_v16 = vld [vmem:[%s3100_s3 + $0x1a0] sm:$0xff] }
 0x17d   : > { %722 = vmatmul.mubr.f32.vlgmr.msra.gmra.mrb[6].mxu0 %v655_v19  ;;  %v2398_v19 = vpack.c.bf16 %v2116_v16, %v2112_v15 }
 0x17e   : > { %2367 = vmatpush1.bf16.msra.mxu0 %v2366_v20  ;;  %834 = vmatprep.mubr.f32.mxu0 %v2477_v27  ;;  %v2121_v20 = vld [vmem:[%s3100_s3 + $0x1c8] sm:$0x1f] }
 0x17f   : > { %2064 = vmatprep.subr.msk.mxu0 %vm757_vm0, %v2061_v24  ;;  %v2118_v24 = vld [vmem:[%s3100_s3 + $0x1b0] sm:$0xff] }
 0x180   : > { %v2402_v28 = vpack.c.bf16 %v2118_v24, %v2114_v23  ;;  %v1967_v24 = vlaneseq }
 0x182   : > { %2065 = vmatpush1.msk.msra.mxu0 %vm757_vm0, %v2060_v26  ;;  %v2400_v26 = vpack.c.bf16 %v2119_v22, %v2115_v21  ;;  %v2478_v22 = vmov 1966171168   ;;  %vm1989_vm3 = vcmp.lt.s32.totalorder %v1967_v24, 512 }
 0x183   : > { %v1965_v23 = vunpack.c.l.s4 %v2478_v22 }
 0x250   : > { %v2826_v30 = vpop.f32.mrb[6].mxu0 }
 0x251   : > { %v725_v32 = vpop.f32.mrb[7].mxu0  ;;  %v753_v33 = vrot.slane %v2826_v30, 1  ;;  %v1081_v58 = vrot.slane %v2826_v30, 2  ;;  %v1255_v11 = vrot.slane %v2826_v30, 3  ;;  %v1429_v29 = vrot.slane %v2826_v30, 4 }
 0x252   : > { %v2131_v32 = vld [vmem:[%s3100_s3 + $0x1e8] sm:$0xff] }
 0x253   : > { %2069 = vmatmul.mubr.msk.f32.vlgmr.msra.gmra.mrb[6].mxu1 %vm754_vm1, %v753_v33  ;;  %2066 = vmatmul.mubr.msk.f32.vlgmr.msra.gmra.mrb[8].mxu0 %vm754_vm1, %v753_v33  ;;  %v2135_v33 = vld [vmem:[%s3100_s3 + $0x208] sm:$0xff] }
 0x254   : > { %2375 = vmatpush1.bf16.msra.mxu1 %v2374_v31  ;;  %990 = vmatprep.mubr.f32.mxu1 %v2477_v27  ;;  %v2123_v31 = vld [vmem:[%s3100_s3 + $0x1d8] sm:$0x1f]  ;;  %v2404_v37 = vpack.c.bf16 %v2135_v33, %v2131_v32 }
 0x255   : > { %2070 = vmatprep.subr.msk.mxu1 %vm757_vm0, %v736_v34  ;;  %v2130_v34 = vld [vmem:[%s3100_s3 + $0x1e0] sm:$0xff] }
 0x256   : > { %v2406_v38 = vpack.c.bf16 %v2134_v35, %v2130_v34 }
 0x258   : > { %2071 = vmatpush1.msk.msra.mxu1 %vm757_vm0, %v735_v39  ;;  %v2139_v39 = vld [vmem:[%s3100_s3 + $0x228] sm:$0x1f] }
 0x259   : > { %2072 = vmatmul.mubr.msk.f32.vlgmr.msra.gmra.mrb[8].mxu1 %vm754_vm1, %v2826_v30  ;;  %2377 = vmatprep.subr.bf16.mxu1 %v2376_v40  ;;  %v2133_v40 = vld [vmem:[%s3100_s3 + $0x1f8] sm:$0xff] }
 0x25a   : > { %2379 = vmatpush1.bf16.msra.mxu1 %v2378_v41  ;;  %1061 = vmatprep.mubr.f32.mxu1 %v2477_v27  ;;  %v2137_v41 = vld [vmem:[%s3100_s3 + $0x218] sm:$0xff] }
 0x25b   : > { %2073 = vmatprep.subr.msk.mxu1 %vm757_vm0, %v738_v42  ;;  %v2132_v42 = vld [vmem:[%s3100_s3 + $0x1f0] sm:$0xff]  ;;  %v2408_v45 = vpack.c.bf16 %v2137_v41, %v2133_v40 }
 0x25c   : > { %v2410_v46 = vpack.c.bf16 %v2136_v43, %v2132_v42 }
 0x25e   : > { %2074 = vmatpush1.msk.msra.mxu1 %vm757_vm0, %v737_v47  ;;  %v1603_v47 = vrot.slane %v2826_v30, 5 }
 0x25f   : > { %2075 = vmatmul.mubr.msk.f32.vlgmr.msra.gmra.mrb[6].mxu1 %vm754_vm1, %v2826_v30  ;;  %2381 = vmatprep.subr.bf16.mxu1 %v2380_v48  ;;  %v2141_v48 = vld [vmem:[%s3100_s3 + $0x238] sm:$0x1f] }
 0x260   : > { %2383 = vmatpush1.bf16.msra.mxu1 %v2382_v49  ;;  %1160 = vmatprep.mubr.f32.mxu1 %v2477_v27  ;;  %v2149_v49 = vld [vmem:[%s3100_s3 + $0x248] sm:$0xff] }
 0x261   : > { %2088 = vmatprep.subr.msk.mxu1 %vm757_vm0, %v2085_v50  ;;  %v2153_v50 = vld [vmem:[%s3100_s3 + $0x268] sm:$0xff] }
 0x262   : > { %v2412_v54 = vpack.c.bf16 %v2153_v50, %v2149_v49 }
 0x264   : > { %2089 = vmatpush1.msk.msra.mxu1 %vm757_vm0, %v2084_v55  ;;  %v2414_v55 = vpack.c.bf16 %v2152_v52, %v2148_v51 }
 0x265   : > { %2090 = vmatmul.mubr.msk.f32.vlgmr.msra.gmra.mrb[8].mxu1 %vm754_vm1, %v1081_v58  ;;  %2385 = vmatprep.subr.bf16.mxu1 %v2384_v56  ;;  %v2157_v56 = vld [vmem:[%s3100_s3 + $0x288] sm:$0x1f] }
 0x266   : > { %2387 = vmatpush1.bf16.msra.mxu1 %v2386_v57  ;;  %1231 = vmatprep.mubr.f32.mxu1 %v2477_v27  ;;  %v2151_v57 = vld [vmem:[%s3100_s3 + $0x258] sm:$0xff] }
 0x267   : > { %2091 = vmatprep.subr.msk.mxu1 %vm757_vm0, %v2087_v59  ;;  %v2150_v59 = vld [vmem:[%s3100_s3 + $0x250] sm:$0xff] }
 0x268   : > { %v2418_v63 = vpack.c.bf16 %v2154_v60, %v2150_v59 }
 0x26a   : > { %2092 = vmatpush1.msk.msra.mxu1 %vm757_vm0, %v2086_v0  ;;  %v1777_v0 = vrot.slane %v2826_v30, 6 }
 0x26b   : > { %2093 = vmatmul.mubr.msk.f32.vlgmr.msra.gmra.mrb[6].mxu1 %vm754_vm1, %v1081_v58  ;;  %2389 = vmatprep.subr.bf16.mxu1 %v2388_v1  ;;  %v2155_v58 = vld [vmem:[%s3100_s3 + $0x278] sm:$0xff] }
 0x26c   : > { %2391 = vmatpush1.bf16.msra.mxu1 %v2390_v2  ;;  %1334 = vmatprep.mubr.f32.mxu1 %v2477_v27  ;;  %v2416_v62 = vpack.c.bf16 %v2155_v58, %v2151_v57  ;;  %v2159_v1 = vld [vmem:[%s3100_s3 + $0x298] sm:$0x1f]  ;;  %v2158_v2 = vld [vmem:[%s3100_s3 + $0x290] sm:$0x1f] }
 0x26d   : > { %2106 = vmatprep.subr.msk.mxu1 %vm757_vm0, %v2103_v3 }
 0x270   : > { %2107 = vmatpush1.msk.msra.mxu1 %vm757_vm0, %v2102_v8 }
 0x271   : > { %2108 = vmatmul.mubr.msk.f32.vlgmr.msra.gmra.mrb[8].mxu1 %vm754_vm1, %v1255_v11  ;;  %2393 = vmatprep.subr.bf16.mxu1 %v2392_v9 }
 0x272   : > { %2395 = vmatpush1.bf16.msra.mxu1 %v2394_v10  ;;  %1405 = vmatprep.mubr.f32.mxu1 %v2477_v27 }
 0x273   : > { %2109 = vmatprep.subr.msk.mxu1 %vm757_vm0, %v2105_v12 }
 0x276   : > { %2110 = vmatpush1.msk.msra.mxu1 %vm757_vm0, %v2104_v17 }
 0x277   : > { %2111 = vmatmul.mubr.msk.f32.vlgmr.msra.gmra.mrb[6].mxu1 %vm754_vm1, %v1255_v11  ;;  %2397 = vmatprep.subr.bf16.mxu1 %v2396_v18 }
 0x278   : > { %2399 = vmatpush1.bf16.msra.mxu1 %v2398_v19  ;;  %1508 = vmatprep.mubr.f32.mxu1 %v2477_v27 }
 0x279   : > { %2124 = vmatprep.subr.msk.mxu1 %vm757_vm0, %v2121_v20 }
 0x27c   : > { %2125 = vmatpush1.msk.msra.mxu1 %vm757_vm0, %v2120_v25  ;;  %v1966_v25 = vunpack.c.0.s8 %v1965_v23 }
 0x27d   : > { %2126 = vmatmul.mubr.msk.f32.vlgmr.msra.gmra.mrb[8].mxu1 %vm754_vm1, %v1429_v29  ;;  %2401 = vmatprep.subr.bf16.mxu1 %v2400_v26  ;;  %v1968_v26 = vshrl.u32 %v1967_v24, 7 }
 0x27e   : > { %2403 = vmatpush1.bf16.msra.mxu1 %v2402_v28  ;;  %1579 = vmatprep.mubr.f32.mxu1 %v2477_v27 }
 0x27f   : > { %2127 = vmatprep.subr.msk.mxu1 %vm757_vm0, %v2123_v31 }
 0x282   : > { %2128 = vmatpush1.msk.msra.mxu1 %vm757_vm0, %v2122_v36 }
 0x283   : > { %2129 = vmatmul.mubr.msk.f32.vlgmr.msra.gmra.mrb[6].mxu1 %vm754_vm1, %v1429_v29  ;;  %2405 = vmatprep.subr.bf16.mxu1 %v2404_v37  ;;  %v1969_v29 = vsub.s32 %v1966_v25, %v1968_v26 }
 0x284   : > { %2407 = vmatpush1.bf16.msra.mxu1 %v2406_v38  ;;  %1682 = vmatprep.mubr.f32.mxu1 %v2477_v27 }
 0x285   : > { %2142 = vmatprep.subr.msk.mxu1 %vm757_vm0, %v2139_v39 }
 0x288   : > { %2143 = vmatpush1.msk.msra.mxu1 %vm757_vm0, %v2138_v44 }
 0x289   : > { %2144 = vmatmul.mubr.msk.f32.vlgmr.msra.gmra.mrb[8].mxu1 %vm754_vm1, %v1603_v47  ;;  %2409 = vmatprep.subr.bf16.mxu1 %v2408_v45 }
 0x28a   : > { %2411 = vmatpush1.bf16.msra.mxu1 %v2410_v46  ;;  %1753 = vmatprep.mubr.f32.mxu1 %v2477_v27 }
 0x28b   : > { %2145 = vmatprep.subr.msk.mxu1 %vm757_vm0, %v2141_v48 }
 0x28e   : > { %2146 = vmatpush1.msk.msra.mxu1 %vm757_vm0, %v2140_v53 }
 0x28f   : > { %2147 = vmatmul.mubr.msk.f32.vlgmr.msra.gmra.mrb[6].mxu1 %vm754_vm1, %v1603_v47  ;;  %2413 = vmatprep.subr.bf16.mxu1 %v2412_v54 }
 0x290   : > { %2415 = vmatpush1.bf16.msra.mxu1 %v2414_v55  ;;  %1856 = vmatprep.mubr.f32.mxu1 %v2477_v27 }
 0x291   : > { %2160 = vmatprep.subr.msk.mxu1 %vm757_vm0, %v2157_v56 }
 0x294   : > { %2161 = vmatpush1.msk.msra.mxu1 %vm757_vm0, %v2156_v61 }
 0x295   : > { %2162 = vmatmul.mubr.msk.f32.vlgmr.msra.gmra.mrb[8].mxu1 %vm754_vm1, %v1777_v0  ;;  %2417 = vmatprep.subr.bf16.mxu1 %v2416_v62 }
 0x296   : > { %2419 = vmatpush1.bf16.msra.mxu1 %v2418_v63  ;;  %1927 = vmatprep.mubr.f32.mxu1 %v2477_v27 }
 0x297   : > { %2163 = vmatprep.subr.msk.mxu1 %vm757_vm0, %v2159_v1 }
 0x29a   : > { %2164 = vmatpush1.msk.msra.mxu1 %vm757_vm0, %v2158_v2 }
 0x29b   : > { %2165 = vmatmul.mubr.msk.f32.vlgmr.msra.gmra.mrb[6].mxu1 %vm754_vm1, %v1777_v0 }
 0x326   : > { %v836_v30 = vpop.f32.mrb[8].mxu0 }
 0x327   : > { %v838_v3 = vpop.f32.mrb[9].mxu0 }
 0x368   : > { %v1858_v4 = vpop.f32.mrb[8].mxu1 }
 0x369   : > { %v2426_v5 = vadd.f32 %v1858_v4, %v836_v30  ;;  %v1860_v6 = vpop.f32.mrb[9].mxu1 }
 0x36a   : > { %v2427_v7 = vadd.f32 %v1860_v6, %v838_v3 }
 0x36b   : > { %v1938_v8 = vmul.f32 %v2426_v5, %v2426_v5 }
 0x36c   : > { %v1939_v9 = vmul.f32 %v2427_v7, %v2427_v7 }
 0x36d   : > { %v1943_v27 = vsel %vm1942_vm2, %v1938_v8, 0.0 }
 0x36e   : > { %v1944_v10 = vsel %vm1942_vm2, %v1939_v9, 0.0  ;;  %v1929_v11 = vpop.f32.mrb[6].mxu1 }
 0x36f   : > { %v1940_v12 = vmul.f32 %v1929_v11, %v1929_v11  ;;  %v1931_v13 = vpop.f32.mrb[7].mxu1  ;;  %v1945_v14 = vadd.f32 %v1944_v10, %v1943_v27 }
 0x370   : > { %v1941_v15 = vmul.f32 %v1931_v13, %v1931_v13 }
 0x371   : > { %v1946_v16 = vsel %vm1942_vm2, %v1940_v12, 0.0 }
 0x372   : > { %v1947_v17 = vadd.f32 %v1946_v16, %v1945_v14  ;;  %v1948_v18 = vsel %vm1942_vm2, %v1941_v15, 0.0 }
 0x374   : > { %v1949_v19 = vadd.f32 %v1948_v18, %v1947_v17 }
 0x376   : > { %1950 = vadd.xlane.f32.xlu0 %v1949_v19 }
 0x403   : > { %v1951_v20 = vpop.xlane.xlu0 %1950 }
 0x404   : > { %v1952_v21 = vadd.f32 1e-12, %v1951_v20 }
 0x406   : > { %2467 = vrsqrt.f32 %v1952_v21 }
 0x410   : > { %v2468_v28 = vpop.eup %2467 }
 0x411   : > { %v1954_v31 = vmul.f32 %v2468_v28, %v2426_v5  ;;  %v1955_v32 = vmul.f32 %v2468_v28, %v2427_v7  ;;  %v1956_v33 = vmul.f32 %v2468_v28, %v1929_v11  ;;  %v1957_v34 = vmul.f32 %v2468_v28, %v1931_v13 }
 0x413   : > { %v1962_v35 = vcombine.low %v1954_v31, %v1955_v32  ;;  %v1963_v36 = vcombine.low %v1956_v33, %v1957_v34 }
 0x415   : > { %v1970_v37 = vrot.slane %v1962_v35, %v1969_v29  ;;  %v1977_v38 = vrot.slane %v1963_v36, %v1969_v29 }
 0x417   : > { %v1978_v39 = vcombine.low %v1970_v37, %v1977_v38 }
 0x419   : > { %v1985_v40 = vrot.slane %v1978_v39, %v1969_v29 }
 0x41b   : > { %1991 = vst.msk [vmem:[%s195_s14] sm:$0xf] %vm1989_vm3, %v1985_v40 }
 0x41c PF: > { %s14_s15 = sadd.s32 1, %s2475_s15  }
 0x41d   : > { %p11_p4 = scmp.ge.s32.totalorder %s14_s15, 6  }
 0x41f   :  { %13 = sbr.rel (!%p11_p4) target bundleno = 1 (0x1), region = 72 }

</bundles_post_ra>
